<compile_context>
chip_gen: v7x
topology: tpu7x:2x2x1
jax: 0.10.0
libtpu: 0.0.40
codegen_flags: <defaults>
</compile_context>

<pallas_src>
import functools

import jax
import jax.numpy as jnp
from jax.experimental import pallas as pl
from jax.experimental.pallas import tpu as pltpu

_SLOPE = 0.2  # LeakyReLU negative slope


# ---------------------------------------------------------------------------
# Kernel
# ---------------------------------------------------------------------------
def _conv_block(x, w, b, *, full_taps, slope):
    """One Conv1d(k=3, stride=1, padding=1) layer (+ optional LeakyReLU).

    full_taps=False (L == 1 fast path, what the module's forward uses):
        x: (B*L, Cin) value, w: (Cin, Cout) centre-tap weight, b: (1, Cout)
    full_taps=True (general L, channels-last):
        x: (B, L, Cin) value, w: (3*Cin, Cout) concatenated-tap weight, b: (1, Cout)
    """
    if full_taps:
        B, L, C = x.shape
        zrow = jnp.zeros((B, 1, C), jnp.float32)
        x_m1 = jnp.concatenate([zrow, x[:, : L - 1, :]], axis=1)   # x[l-1] (zero at l=0)
        x_p1 = jnp.concatenate([x[:, 1:, :], zrow], axis=1)        # x[l+1] (zero at l=L-1)
        m = jnp.concatenate([x_m1, x, x_p1], axis=-1).reshape(B * L, 3 * C)
    else:
        m = x                                                      # (B*L, Cin)
    y = jnp.dot(m, w, preferred_element_type=jnp.float32) + b
    if slope is not None:
        y = jnp.where(y >= 0, y, slope * y)
    if full_taps:
        y = y.reshape(x.shape[0], x.shape[1], -1)
    return y


def _encoder_kernel(x_ref, w0_ref, b0_ref, w1_ref, b1_ref, w2_ref, b2_ref,
                    o_ref, *, full_taps):
    """Fused 3-layer conv stack; intermediates stay on-chip."""
    x = x_ref[...].astype(jnp.float32)
    h = _conv_block(x, w0_ref[...], b0_ref[...], full_taps=full_taps, slope=_SLOPE)
    h = _conv_block(h, w1_ref[...], b1_ref[...], full_taps=full_taps, slope=_SLOPE)
    y = _conv_block(h, w2_ref[...], b2_ref[...], full_taps=full_taps, slope=None)
    o_ref[...] = y.astype(o_ref.dtype)


# ---------------------------------------------------------------------------
# Wrappers
# ---------------------------------------------------------------------------
def fused_encoder_cl(kernel_params, x_cl):
    """Run the fused encoder on a channels-last activation x_cl: (B, L, Cin).

    Returns (B, L, Cout).  kernel_params[i] = (w_cat (3Cin,Cout), w_center (Cin,Cout),
    bias_row (1,Cout)), precomputed in init_encoder_params.
    """
    B, L, Cin = x_cl.shape
    full_taps = L > 1
    Cout = kernel_params[-1][2].shape[-1]

    if full_taps:
        x_arg = x_cl
        x_spec = pl.BlockSpec((B, L, Cin), lambda i: (0, 0, 0))
        out_shape = jax.ShapeDtypeStruct((B, L, Cout), x_cl.dtype)
        out_spec = pl.BlockSpec((B, L, Cout), lambda i: (0, 0, 0))
    else:
        # L == 1: work on a lane-dense (rows, channels) slab, no in-kernel reshapes.
        x_arg = x_cl.reshape(B, Cin)
        x_spec = pl.BlockSpec((B, Cin), lambda i: (0, 0))
        out_shape = jax.ShapeDtypeStruct((B, Cout), x_cl.dtype)
        out_spec = pl.BlockSpec((B, Cout), lambda i: (0, 0))

    args = [x_arg]
    in_specs = [x_spec]
    for (w_cat, w_center, b_row) in kernel_params:
        w = w_cat if full_taps else w_center
        args += [w, b_row]
        in_specs += [pl.BlockSpec(w.shape, lambda i: (0, 0)),
                     pl.BlockSpec(b_row.shape, lambda i: (0, 0))]

    y = pl.pallas_call(
        functools.partial(_encoder_kernel, full_taps=full_taps),
        out_shape=out_shape,
        grid=(1,),                       # whole batch in one invocation
        in_specs=in_specs,
        out_specs=out_spec,
        compiler_params=pltpu.CompilerParams(
            dimension_semantics=("arbitrary",)),
    )(*args)

    if not full_taps:
        y = y.reshape(B, L, Cout)
    return y


def encoder_forward(kernel_params, x):
    """Faithful to the PyTorch module: x (N, C_in) -> unsqueeze(-1) -> cnn
    -> (N, C_out, 1)."""
    B, Cin = x.shape
    y_cl = fused_encoder_cl(kernel_params, x.reshape(B, 1, Cin))   # (B, 1, Cout)
    return jnp.transpose(y_cl, (0, 2, 1))                          # (B, Cout, 1)


# ---------------------------------------------------------------------------
# Params
# ---------------------------------------------------------------------------
def init_encoder_params(key, in_channels, out_channels, dtype=jnp.float32):
    """Deterministic synthetic params.

    Returns (torch_params, kernel_params):
      torch_params[i]  = (W (Cout, Cin, 3), b (Cout,))   -- PyTorch Conv1d layout
      kernel_params[i] = (w_cat (3*Cin, Cout), w_center (Cin, Cout), b_row (1, Cout))
    The kernel-side matmul forms are precomputed here, once, so the forward path
    does no weight transposes/reshapes.
    """
    dims = [(in_channels, 128), (128, 64), (64, out_channels)]
    torch_params, kernel_params = [], []
    for i, (cin, cout) in enumerate(dims):
        kw, kb = jax.random.split(jax.random.fold_in(key, i))
        bound = (1.0 / (cin * 3)) ** 0.5
        w = jax.random.uniform(kw, (cout, cin, 3), dtype, -bound, bound)
        b = jax.random.uniform(kb, (cout,), dtype, -bound, bound)
        torch_params.append((w, b))
        # w_cat[k*Cin + c, o] = W[o, c, k]   (taps ordered x[l-1], x[l], x[l+1])
        w_cat = jnp.transpose(w, (2, 1, 0)).reshape(3 * cin, cout)
        w_center = jnp.transpose(w[:, :, 1], (1, 0))               # (Cin, Cout)
        kernel_params.append((w_cat, w_center, b.reshape(1, cout)))
    return torch_params, kernel_params


# ---------------------------------------------------------------------------
# Pure-JAX reference (independent of the kernel's weight preprocessing):
# uses lax.conv_general_dilated directly on PyTorch-layout weights.
# ---------------------------------------------------------------------------
def _reference_forward(torch_params, x):
    h = x[:, :, None]                                              # unsqueeze(-1)
    n_layers = len(torch_params)
    for i, (w, b) in enumerate(torch_params):
        h = jax.lax.conv_general_dilated(
            h, w, window_strides=(1,), padding=((1, 1),),
            dimension_numbers=("NCH", "OIH", "NCH")) + b[None, :, None]
        if i < n_layers - 1:
            h = jnp.where(h >= 0, h, _SLOPE * h)
    return h                                                       # (N, Cout, 1)


# ---------------------------------------------------------------------------
if __name__ == "__main__":
    key = jax.random.PRNGKey(0)
    in_channels, out_channels, batch = 4, 8, 2

    kp, kx = jax.random.split(key)
    torch_params, kernel_params = init_encoder_params(kp, in_channels, out_channels)
    x = jax.random.normal(kx, (batch, in_channels), jnp.float32)

    fwd = jax.jit(encoder_forward)
    out = jax.block_until_ready(fwd(kernel_params, x))
    ref = jax.block_until_ready(_reference_forward(torch_params, x))

    assert out.shape == (batch, out_channels, 1), out.shape
    assert jnp.allclose(out, ref, atol=1e-4, rtol=1e-4), "mismatch vs lax.conv reference"
    print("KERNEL_OK")
</pallas_src>

<mosaic_0001>
module attributes {stable_mosaic.version = 11 : i64} {
  func.func @_encoder_kernel(%arg0: i32, %arg1: memref<2x4xf32, #tpu.memory_space<vmem>>, %arg2: memref<4x128xf32, #tpu.memory_space<vmem>>, %arg3: memref<1x128xf32, #tpu.memory_space<vmem>>, %arg4: memref<128x64xf32, #tpu.memory_space<vmem>>, %arg5: memref<1x64xf32, #tpu.memory_space<vmem>>, %arg6: memref<64x8xf32, #tpu.memory_space<vmem>>, %arg7: memref<1x8xf32, #tpu.memory_space<vmem>>, %arg8: memref<2x8xf32, #tpu.memory_space<vmem>>) attributes {dimension_semantics = [#tpu.dimension_semantics<arbitrary>], iteration_bounds = array<i64: 1>, scalar_prefetch = 0 : i64, scratch_operands = 0 : i64, tpu.core_type = #tpu.core_type<tc>, window_params = [{pipeline_mode = #tpu.pipeline_mode<synchronous>, transform_indices = @transform_0, window_bounds = array<i64: 2, 4>}, {pipeline_mode = #tpu.pipeline_mode<synchronous>, transform_indices = @transform_1, window_bounds = array<i64: 4, 128>}, {pipeline_mode = #tpu.pipeline_mode<synchronous>, transform_indices = @transform_2, window_bounds = array<i64: 1, 128>}, {pipeline_mode = #tpu.pipeline_mode<synchronous>, transform_indices = @transform_3, window_bounds = array<i64: 128, 64>}, {pipeline_mode = #tpu.pipeline_mode<synchronous>, transform_indices = @transform_4, window_bounds = array<i64: 1, 64>}, {pipeline_mode = #tpu.pipeline_mode<synchronous>, transform_indices = @transform_5, window_bounds = array<i64: 64, 8>}, {pipeline_mode = #tpu.pipeline_mode<synchronous>, transform_indices = @transform_6, window_bounds = array<i64: 1, 8>}, {pipeline_mode = #tpu.pipeline_mode<synchronous>, transform_indices = @transform_7, window_bounds = array<i64: 2, 8>}]} {
    %c0 = arith.constant 0 : index
    %c0_0 = arith.constant 0 : index
    %0 = vector.load %arg1[%c0, %c0_0] : memref<2x4xf32, #tpu.memory_space<vmem>>, vector<2x4xf32>
    %c0_1 = arith.constant 0 : index
    %c0_2 = arith.constant 0 : index
    %1 = vector.load %arg2[%c0_1, %c0_2] : memref<4x128xf32, #tpu.memory_space<vmem>>, vector<4x128xf32>
    %c0_3 = arith.constant 0 : index
    %c0_4 = arith.constant 0 : index
    %2 = vector.load %arg3[%c0_3, %c0_4] : memref<1x128xf32, #tpu.memory_space<vmem>>, vector<1x128xf32>
    %cst = arith.constant dense<0.000000e+00> : vector<2x128xf32>
    %3 = tpu.matmul %0, %1, %cst {dimension_numbers = #tpu.dot_dimension_numbers<[1], [0], [0], [1], [0, 0, 1, 1], [], []>} : vector<2x4xf32>, vector<4x128xf32>, vector<2x128xf32> -> vector<2x128xf32>
    %4 = vector.broadcast %2 : vector<1x128xf32> to vector<2x128xf32>
    %5 = arith.addf %3, %4 : vector<2x128xf32>
    %cst_5 = arith.constant 0.000000e+00 : f32
    %6 = vector.broadcast %cst_5 : f32 to vector<2x128xf32>
    %7 = arith.cmpf oge, %5, %6 : vector<2x128xf32>
    %cst_6 = arith.constant 2.000000e-01 : f32
    %8 = vector.broadcast %cst_6 : f32 to vector<2x128xf32>
    %9 = arith.mulf %8, %5 : vector<2x128xf32>
    %10 = arith.select %7, %5, %9 : vector<2x128xi1>, vector<2x128xf32>
    %c0_7 = arith.constant 0 : index
    %c0_8 = arith.constant 0 : index
    %11 = vector.load %arg4[%c0_7, %c0_8] : memref<128x64xf32, #tpu.memory_space<vmem>>, vector<128x64xf32>
    %c0_9 = arith.constant 0 : index
    %c0_10 = arith.constant 0 : index
    %12 = vector.load %arg5[%c0_9, %c0_10] : memref<1x64xf32, #tpu.memory_space<vmem>>, vector<1x64xf32>
    %cst_11 = arith.constant dense<0.000000e+00> : vector<2x64xf32>
    %13 = tpu.matmul %10, %11, %cst_11 {dimension_numbers = #tpu.dot_dimension_numbers<[1], [0], [0], [1], [0, 0, 1, 1], [], []>} : vector<2x128xf32>, vector<128x64xf32>, vector<2x64xf32> -> vector<2x64xf32>
    %14 = vector.broadcast %12 : vector<1x64xf32> to vector<2x64xf32>
    %15 = arith.addf %13, %14 : vector<2x64xf32>
    %cst_12 = arith.constant 0.000000e+00 : f32
    %16 = vector.broadcast %cst_12 : f32 to vector<2x64xf32>
    %17 = arith.cmpf oge, %15, %16 : vector<2x64xf32>
    %cst_13 = arith.constant 2.000000e-01 : f32
    %18 = vector.broadcast %cst_13 : f32 to vector<2x64xf32>
    %19 = arith.mulf %18, %15 : vector<2x64xf32>
    %20 = arith.select %17, %15, %19 : vector<2x64xi1>, vector<2x64xf32>
    %c0_14 = arith.constant 0 : index
    %c0_15 = arith.constant 0 : index
    %21 = vector.load %arg6[%c0_14, %c0_15] : memref<64x8xf32, #tpu.memory_space<vmem>>, vector<64x8xf32>
    %c0_16 = arith.constant 0 : index
    %c0_17 = arith.constant 0 : index
    %22 = vector.load %arg7[%c0_16, %c0_17] : memref<1x8xf32, #tpu.memory_space<vmem>>, vector<1x8xf32>
    %cst_18 = arith.constant dense<0.000000e+00> : vector<2x8xf32>
    %23 = tpu.matmul %20, %21, %cst_18 {dimension_numbers = #tpu.dot_dimension_numbers<[1], [0], [0], [1], [0, 0, 1, 1], [], []>} : vector<2x64xf32>, vector<64x8xf32>, vector<2x8xf32> -> vector<2x8xf32>
    %24 = vector.broadcast %22 : vector<1x8xf32> to vector<2x8xf32>
    %25 = arith.addf %23, %24 : vector<2x8xf32>
    %c0_19 = arith.constant 0 : index
    %c0_20 = arith.constant 0 : index
    %26 = vector.load %arg8[%c0_19, %c0_20] : memref<2x8xf32, #tpu.memory_space<vmem>>, vector<2x8xf32>
    tpu.vector_store %arg8[%c0_19, %c0_20], %25 {strides = array<i32>} : memref<2x8xf32, #tpu.memory_space<vmem>>, vector<2x8xf32>,
    return
  }
  func.func @transform_0(%arg0: i32) -> (i32, i32) {
    %c0_i32 = arith.constant 0 : i32
    %c0_i32_0 = arith.constant 0 : i32
    %c0_i32_1 = arith.constant 0 : i32
    return %c0_i32, %c0_i32_0 : i32, i32
  }
  func.func @transform_1(%arg0: i32) -> (i32, i32) {
    %c0_i32 = arith.constant 0 : i32
    %c0_i32_0 = arith.constant 0 : i32
    %c0_i32_1 = arith.constant 0 : i32
    return %c0_i32, %c0_i32_0 : i32, i32
  }
  func.func @transform_2(%arg0: i32) -> (i32, i32) {
    %c0_i32 = arith.constant 0 : i32
    %c0_i32_0 = arith.constant 0 : i32
    %c0_i32_1 = arith.constant 0 : i32
    return %c0_i32, %c0_i32_0 : i32, i32
  }
  func.func @transform_3(%arg0: i32) -> (i32, i32) {
    %c0_i32 = arith.constant 0 : i32
    %c0_i32_0 = arith.constant 0 : i32
    %c0_i32_1 = arith.constant 0 : i32
    return %c0_i32, %c0_i32_0 : i32, i32
  }
  func.func @transform_4(%arg0: i32) -> (i32, i32) {
    %c0_i32 = arith.constant 0 : i32
    %c0_i32_0 = arith.constant 0 : i32
    %c0_i32_1 = arith.constant 0 : i32
    return %c0_i32, %c0_i32_0 : i32, i32
  }
  func.func @transform_5(%arg0: i32) -> (i32, i32) {
    %c0_i32 = arith.constant 0 : i32
    %c0_i32_0 = arith.constant 0 : i32
    %c0_i32_1 = arith.constant 0 : i32
    return %c0_i32, %c0_i32_0 : i32, i32
  }
  func.func @transform_6(%arg0: i32) -> (i32, i32) {
    %c0_i32 = arith.constant 0 : i32
    %c0_i32_0 = arith.constant 0 : i32
    %c0_i32_1 = arith.constant 0 : i32
    return %c0_i32, %c0_i32_0 : i32, i32
  }
  func.func @transform_7(%arg0: i32) -> (i32, i32) {
    %c0_i32 = arith.constant 0 : i32
    %c0_i32_0 = arith.constant 0 : i32
    %c0_i32_1 = arith.constant 0 : i32
    return %c0_i32, %c0_i32_0 : i32, i32
  }
}

</mosaic_0001>

<bundles_post_ra>
// kernel: encoder_forward.1
= control target key start
LH: loop header
LB: loop body
LE: loop exit
PB: predicated region body
PF: predicated region fallthrough
CT: control target
= control target key end

     0   :  { %vm40_vm0 = vcmask 1043456   ;;  %vm36_vm1 = vcmask 31744   ;;  %v475_v1 = vmov 0.0   ;;  %vm476_vm2 = vmmov 0   ;;  %s621_s0 = inlined_call_operand.vmem [shape: f32[2,4], index: 0, kind: input, shape index: {}]   ;;  %s622_s1 = inlined_call_operand.vmem [shape: f32[4,128], index: 1, kind: input, shape index: {}]   ;;  %s623_s2 = inlined_call_operand.vmem [shape: f32[1,128], index: 2, kind: input, shape index: {}]   ;;  %s624_s3 = inlined_call_operand.vmem [shape: f32[128,64], index: 3, kind: input, shape index: {}]   ;;  %s625_s4 = inlined_call_operand.vmem [shape: f32[1,64], index: 4, kind: input, shape index: {}]   ;;  %s626_s5 = inlined_call_operand.vmem [shape: f32[64,8], index: 5, kind: input, shape index: {}]   ;;  %s627_s6 = inlined_call_operand.vmem [shape: f32[1,8], index: 6, kind: input, shape index: {}]   ;;  %s628_s7 = inlined_call_operand.hbm [shape: f32[2,8], index: 7, kind: output, shape index: {}]  }
   0x1   :  { %v28_v0 = vld [vmem:[%s622_s1] sm:$0xf]  ;;  %352 = vmatprep.subr.mxu0 %v475_v1  ;;  %354 = vmatprep.mubr.msk.f32.mxu0 %vm476_vm2, %v475_v1  ;;  %v118_v4 = vld [vmem:[%s624_s3 + $0x8] sm:$0xff]  ;;  %v477_v5 = vmov 0.0|0.0   ;;  %v119_v7 = vld [vmem:[%s624_s3 + $0x10] sm:$0xff] }
   0x2   :  { %v27_v2 = vld [vmem:[%s621_s0] sm:$0x3]  ;;  %353 = vmatpush3.msk.msra.mxu0 %vm40_vm0, %v28_v0  ;;  %411 = vmatprep.subr.bf16.mxu1 %v477_v5  ;;  %v120_v8 = vld [vmem:[%s624_s3 + $0x18] sm:$0xff]  ;;  %v122_v11 = vld [vmem:[%s624_s3 + $0x28] sm:$0xff] }
   0x3   :  { %v117_v3 = vld [vmem:[%s624_s3] sm:$0xff]  ;;  %355 = vmatmul.mubr.msk.f32.vlgmr.msra.gmra.mrb[0].mxu0 %vm36_vm1, %v27_v2  ;;  %389 = vmatprep.mubr.msk.f32.mxu1 %vm476_vm2, %v475_v1  ;;  %v415_v9 = vpack.c.bf16 %v120_v8, %v119_v7 }
   0x4   :  { %v412_v6 = vpack.c.bf16 %v118_v4, %v117_v3  ;;  %435 = vmatprep.subr.bf16.mxu0 %v477_v5  ;;  %v121_v10 = vld [vmem:[%s624_s3 + $0x20] sm:$0xff]  ;;  %408 = vmatprep.mubr.msk.f32.mxu0 %vm476_vm2, %v475_v1 }
   0x6   :  { %413 = vmatpush3.bf16.msra.mxu1 %v412_v6 }
   0x7   :  { %414 = vmatprep.subr.bf16.mxu1 %v477_v5 }
   0x8   :  { %12 = vsyncpa [#allocation3], 0  ;;  %v418_v12 = vpack.c.bf16 %v122_v11, %v121_v10  ;;  %v123_v13 = vld [vmem:[%s624_s3 + $0x30] sm:$0xff]  ;;  %v124_v14 = vld [vmem:[%s624_s3 + $0x38] sm:$0xff]  ;;  %vm228_vm5 = vcmask 523264   ;;  %s478_s30 = smov [#allocation2]  }
   0x9   :  { %v421_v15 = vpack.c.bf16 %v124_v14, %v123_v13  ;;  %v125_v16 = vld [vmem:[%s624_s3 + $0x40] sm:$0xff]  ;;  %v126_v17 = vld [vmem:[%s624_s3 + $0x48] sm:$0xff]  ;;  %v127_v19 = vld [vmem:[%s624_s3 + $0x50] sm:$0xff]  ;;  %vm302_vm6 = vcmask 58368  }
   0xa   :  { %416 = vmatpush3.bf16.msra.mxu1 %v415_v9  ;;  %v424_v18 = vpack.c.bf16 %v126_v17, %v125_v16  ;;  %v128_v20 = vld [vmem:[%s624_s3 + $0x58] sm:$0xff]  ;;  %v129_v22 = vld [vmem:[%s624_s3 + $0x60] sm:$0xff]  ;;  %v130_v23 = vld [vmem:[%s624_s3 + $0x68] sm:$0xff] }
   0xb   :  { %417 = vmatprep.subr.bf16.mxu1 %v477_v5  ;;  %v427_v21 = vpack.c.bf16 %v128_v20, %v127_v19  ;;  %v430_v24 = vpack.c.bf16 %v130_v23, %v129_v22  ;;  %v131_v25 = vld [vmem:[%s624_s3 + $0x70] sm:$0xff]  ;;  %v132_v26 = vld [vmem:[%s624_s3 + $0x78] sm:$0xff]  ;;  %v213_v28 = vld [vmem:[%s626_s5] sm:$0xff] }
   0xc   :  { %v433_v27 = vpack.c.bf16 %v132_v26, %v131_v25  ;;  %v214_v29 = vld [vmem:[%s626_s5 + $0x8] sm:$0xff]  ;;  %v215_v30 = vld [vmem:[%s626_s5 + $0x10] sm:$0xff]  ;;  %v216_v32 = vld [vmem:[%s626_s5 + $0x18] sm:$0xff] }
   0xd   :  { %v436_v31 = vpack.c.bf16 %v214_v29, %v213_v28  ;;  %v439_v33 = vpack.c.bf16 %v216_v32, %v215_v30  ;;  %v217_v34 = vld [vmem:[%s626_s5 + $0x20] sm:$0xff]  ;;  %v218_v35 = vld [vmem:[%s626_s5 + $0x28] sm:$0xff]  ;;  %v219_v43 = vld [vmem:[%s626_s5 + $0x30] sm:$0xff] }
   0xe   :  { %419 = vmatpush3.bf16.msra.mxu1 %v418_v12  ;;  %v442_v36 = vpack.c.bf16 %v218_v35, %v217_v34  ;;  %v318_v37 = vld [vmem:[%s623_s2] ss:$0 sm:$0xff]  ;;  %v220_v44 = vld [vmem:[%s626_s5 + $0x38] sm:$0xff]  ;;  %s310_s5 = sshll.u32 %s478_s30, 4  ;;  %s311_s5 = int_to_ptr.vmem [resolvable:$true] %s310_s5 }
   0xf   :  { %420 = vmatprep.subr.bf16.mxu1 %v477_v5  ;;  %437 = vmatpush3.bf16.msra.mxu0 %v436_v31  ;;  %v445_v45 = vpack.c.bf16 %v220_v44, %v219_v43  ;;  %v321_v46 = vld [vmem:[%s625_s4] ss:$0 sm:$0xff]  ;;  %s451_s4 = scalar_lea.vmem %s311_s5, 32  ;;  %p456_p1 = scmp.lt.s32.totalorder %s311_s5, %s311_s5 }
  0x10   :  { %438 = vmatprep.subr.bf16.mxu0 %v477_v5  ;;  %v322_v52 = vld [vmem:[%s627_s6] ss:$0 sm:$0xff]  ;;  %p452_p0 = scmp.ne.s32.totalorder %s311_s5, %s451_s4  ;;  %p457_p2 = scmp.lt.s32.totalorder %s451_s4, %s451_s4 }
  0x12   :  { %422 = vmatpush3.bf16.msra.mxu1 %v421_v15  ;;  %p458_p3 = por %p457_p2, %p456_p1 }
  0x13   :  { %423 = vmatprep.subr.bf16.mxu1 %v477_v5  ;;  %440 = vmatpush3.bf16.msra.mxu0 %v439_v33 }
  0x14   :  { %441 = vmatprep.subr.bf16.mxu0 %v477_v5  ;;  %p459_p4 = pnand %p458_p3, %p452_p0 }
  0x16   :  { %425 = vmatpush3.bf16.msra.mxu1 %v424_v18 }
  0x17   :  { %426 = vmatprep.subr.bf16.mxu1 %v477_v5  ;;  %443 = vmatpush3.bf16.msra.mxu0 %v442_v36 }
  0x18   :  { %444 = vmatprep.subr.bf16.mxu0 %v477_v5 }
  0x1a   :  { %428 = vmatpush3.bf16.msra.mxu1 %v427_v21 }
  0x1b   :  { %429 = vmatprep.subr.bf16.mxu1 %v477_v5  ;;  %446 = vmatpush3.bf16.msra.mxu0 %v445_v45 }
  0x1e   :  { %431 = vmatpush3.bf16.msra.mxu1 %v430_v24 }
  0x1f   :  { %432 = vmatprep.subr.bf16.mxu1 %v477_v5 }
  0x22   :  { %434 = vmatpush3.bf16.msra.mxu1 %v433_v27 }
  0xd6   :  { %v110_v38 = vpop.f32.mrb[0].mxu0 }
  0xd7   :  { %v111_v39 = vadd.f32 %v318_v37, %v110_v38  ;;  %v356_v40 = vpop.f32.mrb[1].mxu0 }
  0xd9   :  { %v115_v41 = vmul.f32 0.2, %v111_v39  ;;  %vm114_vm3 = vcmp.ge.f32.partialorder %v111_v39, 0.0 }
  0xdb   :  { %v116_v42 = vsel %vm114_vm3, %v111_v39, %v115_v41 }
  0xdc   :  { %390 = vmatmul.mubr.f32.vlgmr.msra.gmra.mrb[0].mxu1 %v116_v42 }
 0x1af   :  { %v206_v47 = vpop.f32.mrb[0].mxu1 }
 0x1b0   :  { %v207_v48 = vadd.f32 %v321_v46, %v206_v47  ;;  %v391_v49 = vpop.f32.mrb[1].mxu1 }
 0x1b2   :  { %vm210_vm4 = vcmp.ge.f32.partialorder %v207_v48, 0.0  ;;  %v211_v50 = vmul.f32 0.2, %v207_v48 }
 0x1b4   :  { %v212_v51 = vsel %vm210_vm4, %v207_v48, %v211_v50 }
 0x1b5   :  { %409 = vmatmul.mubr.msk.f32.vlgmr.msra.gmra.mrb[2].mxu0 %vm228_vm5, %v212_v51 }
 0x288   :  { %v298_v53 = vpop.f32.mrb[2].mxu0 }
 0x289   :  { %v299_v54 = vadd.f32 %v322_v52, %v298_v53  ;;  %v410_v55 = vpop.f32.mrb[3].mxu0 }
 0x28b   :  { %303 = vst.msk [vmem:[#allocation2] sm:$0x3] %vm302_vm6, %v299_v54 }
 0x28c   :  { %462 = shalt.err (!%p459_p4)
}
 0x28d   :  { %s463_s9 = scalar_lea.hbm %s628_s7, 32 }
 0x28e   :  { %p464_p5 = scmp.ne.s32.totalorder %s628_s7, %s463_s9  ;;  %p467_p6 = scmp.lt.u32.totalorder %s463_s9, %s628_s7 }
 0x290   :  { %p469_p7 = pnand %p467_p6, %p464_p5 }
 0x292   :  { %472 = shalt.err (!%p469_p7)
}
 0x293   :  { %313 = dma.vmem_to_hbm [thread:$0]  %s311_s5, 32, %s628_s7, [#allocation3]  }
 0x294   :  { %473 = dma.done.wait [#allocation3], 32  }
 0x295   :  { %474 = vsyncadd [#allocation3], 4294967264 }
 0x296   :  { %317 = vsyncpa [#allocation3], 1 }

</bundles_post_ra>
